<compile_context>
chip_gen: v7x
topology: tpu7x:2x2x1
jax: 0.10.0
libtpu: 0.0.40
codegen_flags: <defaults>
</compile_context>

<pallas_src>
import functools

import jax
import jax.numpy as jnp
from jax import lax
from jax.experimental import pallas as pl
from jax.experimental.pallas import tpu as pltpu

IGNORE_INDEX = 0
EPS = 1.0
LANE = 128          # TPU lane width
MAX_ROW_TILE = 4096  # hard cap on 128-lane rows per grid step
ROW_CHUNK = 32       # rows per register chunk (sublane fold 4 -> 1)


def _round_up(x, m):
    return -(-x // m) * m


def _vmem_capacity_bytes():
    try:
        return int(pltpu.get_tpu_info().vmem_capacity_bytes)
    except Exception:
        return 64 << 20  # conservative fallback (v7x per-core VMEM)


def _dice_ce_sums(logp4, tgt3, *, R, r_tile, rc, num_tiles, n_part, half,
                  n_classes, vmem_limit):
    """Per-(foreground-class, batch) partial sums.

    Returns 4 arrays of shape (n_part*CF, N, 8, LANE):
      inter: sum_{tgt==c} exp(logp_c)
      psum : sum_{tgt!=0} exp(logp_c)
      cnt  : #{tgt==c}
      sel  : sum_{tgt==c} logp_c
    """
    N = logp4.shape[0]
    CF = n_classes - 1
    n_chunks = r_tile // rc

    def kernel(logp_ref, tgt_ref, inter_ref, psum_ref, cnt_ref, sel_ref):
        p = pl.program_id(0)
        s = pl.program_id(1)
        c = pl.program_id(2)                     # foreground class index; real class = c + 1

        @pl.when(jnp.logical_and(s == 0, c == 0))
        def _init():
            inter_ref[...] = jnp.zeros_like(inter_ref)
            psum_ref[...] = jnp.zeros_like(psum_ref)
            cnt_ref[...] = jnp.zeros_like(cnt_ref)
            sel_ref[...] = jnp.zeros_like(sel_ref)

        step = p * half + s
        row_base = step * r_tile
        active = step < num_tiles                # clamped overhang step -> skip compute
        needs_mask = row_base + r_tile > R       # only the tail tile has garbage rows
        cls = c + 1

        def fold8(x):                            # (N, rc, LANE) -> (N, 8, LANE), pure VPU adds
            acc = x[:, 0:8, :]
            for g in range(1, rc // 8):
                acc = acc + x[:, g * 8:(g + 1) * 8, :]
            return acc

        def chunk(r0, row_ok):
            tgt = tgt_ref[:, pl.ds(r0, rc), :]                       # (N, rc, LANE) int32
            lp = logp_ref[:, :, pl.ds(r0, rc), :][:, 0].astype(jnp.float32)
            if row_ok is not None:               # tail tile only: kill garbage rows
                tgt = jnp.where(row_ok, tgt, IGNORE_INDEX)
                lp = jnp.where(row_ok, lp, 0.0)
            pr = jnp.exp(lp)                     # EUP
            hit = tgt == cls
            valid = tgt != IGNORE_INDEX
            # selects (not *mask) so a garbage/inf exp can never leak as inf*0 = NaN
            return (fold8(jnp.where(hit, pr, 0.0)),
                    fold8(jnp.where(valid, pr, 0.0)),
                    fold8(hit.astype(jnp.float32)),
                    fold8(jnp.where(hit, lp, 0.0)))

        def run_tile(masked):
            zeros = jnp.zeros((N, 8, LANE), jnp.float32)
            if masked:
                rows = lax.broadcasted_iota(jnp.int32, (1, rc, LANE), 1)  # hoisted out of loop

            def body(ci, carry):
                r0 = pl.multiple_of(ci * rc, rc)
                row_ok = ((row_base + r0 + rows) < R) if masked else None
                di, dp, dc, dsel = chunk(r0, row_ok)
                return (carry[0] + di, carry[1] + dp, carry[2] + dc, carry[3] + dsel)

            ti, tp, tc, tsel = lax.fori_loop(0, n_chunks, body,
                                             (zeros, zeros, zeros, zeros))
            # exactly one accumulator read-modify-write per (tile, class)
            inter_ref[c] = inter_ref[c] + ti
            psum_ref[c] = psum_ref[c] + tp
            cnt_ref[c] = cnt_ref[c] + tc
            sel_ref[c] = sel_ref[c] + tsel

        @pl.when(jnp.logical_and(active, jnp.logical_not(needs_mask)))
        def _fast():
            run_tile(masked=False)

        @pl.when(jnp.logical_and(active, needs_mask))
        def _tail():
            run_tile(masked=True)

    def logp_map(p, s, c):
        return (0, c + 1, jnp.minimum(p * half + s, num_tiles - 1), 0)

    def tgt_map(p, s, c):
        return (0, jnp.minimum(p * half + s, num_tiles - 1), 0)

    def out_map(p, s, c):
        return (p, 0, 0, 0)

    acc_shape = jax.ShapeDtypeStruct((n_part * CF, N, 8, LANE), jnp.float32)
    acc_spec = pl.BlockSpec((CF, N, 8, LANE), out_map)

    return pl.pallas_call(
        kernel,
        out_shape=(acc_shape, acc_shape, acc_shape, acc_shape),
        grid_spec=pltpu.PrefetchScalarGridSpec(
            num_scalar_prefetch=0,
            grid=(n_part, half, CF),
            in_specs=[
                pl.BlockSpec((N, 1, r_tile, LANE), logp_map),   # one foreground class plane
                pl.BlockSpec((N, r_tile, LANE), tgt_map),       # resident across class steps
            ],
            out_specs=[acc_spec, acc_spec, acc_spec, acc_spec],
        ),
        compiler_params=pltpu.CompilerParams(
            dimension_semantics=("parallel", "arbitrary", "arbitrary"),
            vmem_limit_bytes=vmem_limit),
    )(logp4, tgt3)


@functools.partial(jax.jit, static_argnames=("row_tile_override",))
def dice_ce_loss(logp, target, weight=None, *, row_tile_override=None):
    """logp: (N, C, D, H, W) log-probabilities (f32 or bf16); target: (N, D, H, W) int labels."""
    N, C = logp.shape[0], logp.shape[1]
    assert C >= 2, "need at least one foreground class"
    S = 1
    for d in logp.shape[2:]:
        S *= d

    if weight is None:
        weight = jnp.ones((C,), jnp.float32)
    w = jnp.asarray(weight, jnp.float32).reshape(-1)

    # Keep the input dtype (bf16 stays bf16 -> half the log-prob HBM read bytes).
    logp_f = logp.reshape(N, C, S)
    tgt_f = target.reshape(N, S).astype(jnp.int32)

    # Pack the spatial axis as (rows, 128).  Only pads when S is not a multiple of 128.
    s_pad = _round_up(S, LANE)
    if s_pad != S:
        # TODO(synk): fold this pad into the log-softmax producer; it is one extra HBM pass.
        logp_f = jnp.pad(logp_f, ((0, 0), (0, 0), (0, s_pad - S)))
        tgt_f = jnp.pad(tgt_f, ((0, 0), (0, s_pad - S)), constant_values=IGNORE_INDEX)
    R = s_pad // LANE
    logp4 = logp_f.reshape(N, C, R, LANE)
    tgt3 = tgt_f.reshape(N, R, LANE)

    in_itemsize = jnp.dtype(logp4.dtype).itemsize
    cap = _vmem_capacity_bytes()

    # Tile height derived from VMEM capacity (double-buffered class plane + target per row).
    if row_tile_override is not None:
        r_tile = max(8, (int(row_tile_override) // 8) * 8)
    else:
        bytes_per_row = 2 * N * LANE * (in_itemsize + 4)
        budget = max(cap // 3, 8 << 20)
        r_tile = max(32, (budget // bytes_per_row) // 32 * 32)
        r_tile = min(r_tile, MAX_ROW_TILE)
    r_tile = min(r_tile, _round_up(R, 8))
    r_tile = max(8, (r_tile // 8) * 8)
    rc = ROW_CHUNK if r_tile % ROW_CHUNK == 0 else 8

    num_tiles = pl.cdiv(R, r_tile)
    n_part = 2 if num_tiles >= 2 else 1          # engage both TensorCores on dual-TC parts
    half = pl.cdiv(num_tiles, n_part)

    CF = C - 1
    blk_bytes = 2 * N * r_tile * LANE * (in_itemsize + 4)
    acc_bytes = 4 * CF * N * 8 * LANE * 4 * 2
    vmem_limit = int(min(cap, max(blk_bytes + acc_bytes + (8 << 20), 32 << 20)))

    inter_w, psum_w, cnt_w, sel_w = _dice_ce_sums(
        logp4, tgt3, R=R, r_tile=r_tile, rc=rc, num_tiles=num_tiles,
        n_part=n_part, half=half, n_classes=C, vmem_limit=vmem_limit)

    def collapse(acc):  # (n_part*CF, N, 8, LANE) -> (CF, N)
        return acc.reshape(n_part, CF, N, -1).sum(axis=(0, 3))

    inter = collapse(inter_w)          # sum_{t: tgt=c} exp(logp_c)
    psum = collapse(psum_w)            # sum_t exp(logp_c) * (tgt != 0)
    cnt = collapse(cnt_w)              # #voxels with tgt == c
    sel = collapse(sel_w)              # sum_{t: tgt=c} logp_c

    # Weighted NLLLoss (mean, ignore_index=0): class weights applied in the epilogue.
    w_fg = w[1:][:, None]                                  # (CF, 1)
    ce_loss = -jnp.sum(w_fg * sel) / jnp.sum(w_fg * cnt)

    # Soft dice over foreground classes.
    dice = (2.0 * inter + EPS) / (cnt + psum + EPS)        # (CF, N)
    dice = jnp.mean(jnp.sum(dice, axis=0) / CF)
    return 0.8 * ce_loss - 0.2 * jnp.log(dice)


def _reference_loss(logp, target, weight):
    """Pure-JAX reproduction of the PyTorch forward, for validation."""
    N, C = logp.shape[:2]
    valid = (target != IGNORE_INDEX)
    w_t = weight[target]
    logp_t = jnp.take_along_axis(logp, target[:, None].astype(jnp.int32), axis=1)[:, 0]
    ce = jnp.sum(-w_t * logp_t * valid) / jnp.sum(w_t * valid)

    prob = jnp.exp(logp) * valid[:, None]
    tgt_clean = jnp.where(valid, target, 0)
    onehot = jax.nn.one_hot(tgt_clean, C, dtype=jnp.float32)          # (N, D, H, W, C)
    onehot = jnp.transpose(onehot, (0, 4, 1, 2, 3))                   # (N, C, D, H, W)
    inter = jnp.sum(onehot[:, 1:] * prob[:, 1:], axis=(2, 3, 4))
    card = jnp.sum(onehot[:, 1:] + prob[:, 1:], axis=(2, 3, 4))
    dice = (2.0 * inter + EPS) / (card + EPS)
    dice = jnp.mean(jnp.sum(dice, axis=1) / (C - 1))
    return 0.8 * ce - 0.2 * jnp.log(dice)


if __name__ == "__main__":
    key = jax.random.PRNGKey(0)
    k1, k2, k3, k4 = jax.random.split(key, 4)
    weight = jnp.array([0.5, 1.0, 1.5, 2.0], dtype=jnp.float32)

    # ---- case 1: S not a multiple of 128 -> lane pad + masked tail tile (default tiling) ----
    N, C, D, H, W = 2, 4, 12, 12, 12
    logits = jax.random.normal(k1, (N, C, D, H, W), dtype=jnp.float32)
    logp = jax.nn.log_softmax(logits, axis=1)
    target = jax.random.randint(k2, (N, D, H, W), 0, C, dtype=jnp.int32)

    ref = jax.block_until_ready(_reference_loss(logp, target, weight))
    out = jax.block_until_ready(dice_ce_loss(logp, target, weight))
    assert jnp.allclose(out, ref, rtol=1e-4, atol=1e-5), (out, ref)

    # bf16 log-probs stream straight into the kernel (f32 accumulation inside)
    logp_bf = logp.astype(jnp.bfloat16)
    ref_bf = jax.block_until_ready(_reference_loss(logp_bf.astype(jnp.float32), target, weight))
    out_bf = jax.block_until_ready(dice_ce_loss(logp_bf, target, weight))
    assert jnp.allclose(out_bf, ref_bf, rtol=1e-4, atol=1e-5), (out_bf, ref_bf)

    # ---- case 2: forced small tile -> multi-tile grid, 2-way core split, fast + masked tiles
    #              and one clamped overhang step that must be skipped ----
    N2, D2, H2, W2 = 2, 20, 16, 16
    logits2 = jax.random.normal(k3, (N2, C, D2, H2, W2), dtype=jnp.float32)
    logp2 = jax.nn.log_softmax(logits2, axis=1)
    target2 = jax.random.randint(k4, (N2, D2, H2, W2), 0, C, dtype=jnp.int32)

    ref2 = jax.block_until_ready(_reference_loss(logp2, target2, weight))
    out2 = jax.block_until_ready(dice_ce_loss(logp2, target2, weight, row_tile_override=16))
    assert jnp.allclose(out2, ref2, rtol=1e-4, atol=1e-5), (out2, ref2)

    print("KERNEL_OK")
</pallas_src>

<mosaic_0001>
module attributes {stable_mosaic.version = 11 : i64} {
  func.func @kernel(%arg0: i32, %arg1: i32, %arg2: i32, %arg3: memref<2x1x16x128xf32, #tpu.memory_space<vmem>>, %arg4: memref<2x16x128xi32, #tpu.memory_space<vmem>>, %arg5: memref<3x2x8x128xf32, #tpu.memory_space<vmem>>, %arg6: memref<3x2x8x128xf32, #tpu.memory_space<vmem>>, %arg7: memref<3x2x8x128xf32, #tpu.memory_space<vmem>>, %arg8: memref<3x2x8x128xf32, #tpu.memory_space<vmem>>) attributes {dimension_semantics = [#tpu.dimension_semantics<parallel>, #tpu.dimension_semantics<arbitrary>, #tpu.dimension_semantics<arbitrary>], iteration_bounds = array<i64: 1, 1, 3>, scalar_prefetch = 0 : i64, scratch_operands = 0 : i64, tpu.core_type = #tpu.core_type<tc>, window_params = [{transform_indices = @transform_0, window_bounds = array<i64: 2, 1, 16, 128>}, {transform_indices = @transform_1, window_bounds = array<i64: 2, 16, 128>}, {transform_indices = @transform_2, window_bounds = array<i64: 3, 2, 8, 128>}, {transform_indices = @transform_3, window_bounds = array<i64: 3, 2, 8, 128>}, {transform_indices = @transform_4, window_bounds = array<i64: 3, 2, 8, 128>}, {transform_indices = @transform_5, window_bounds = array<i64: 3, 2, 8, 128>}]} {
    %c0_i32 = arith.constant 0 : i32
    %0 = arith.cmpi eq, %arg1, %c0_i32 : i32
    %c0_i32_0 = arith.constant 0 : i32
    %1 = arith.cmpi eq, %arg2, %c0_i32_0 : i32
    %2 = arith.andi %0, %1 : i1
    %3 = arith.extui %2 : i1 to i32
    %c0_i32_1 = arith.constant 0 : i32
    %4 = arith.cmpi ne, %3, %c0_i32_1 : i32
    scf.if %4 {
      %cst = arith.constant 0.000000e+00 : f32
      %19 = vector.broadcast %cst : f32 to vector<3x2x8x128xf32>
      %c0 = arith.constant 0 : index
      %c0_7 = arith.constant 0 : index
      %c0_8 = arith.constant 0 : index
      %c0_9 = arith.constant 0 : index
      %20 = vector.load %arg5[%c0, %c0_7, %c0_8, %c0_9] : memref<3x2x8x128xf32, #tpu.memory_space<vmem>>, vector<3x2x8x128xf32>
      tpu.vector_store %arg5[%c0, %c0_7, %c0_8, %c0_9], %19 {strides = array<i32>} : memref<3x2x8x128xf32, #tpu.memory_space<vmem>>, vector<3x2x8x128xf32>,
      %cst_10 = arith.constant 0.000000e+00 : f32
      %21 = vector.broadcast %cst_10 : f32 to vector<3x2x8x128xf32>
      %c0_11 = arith.constant 0 : index
      %c0_12 = arith.constant 0 : index
      %c0_13 = arith.constant 0 : index
      %c0_14 = arith.constant 0 : index
      %22 = vector.load %arg6[%c0_11, %c0_12, %c0_13, %c0_14] : memref<3x2x8x128xf32, #tpu.memory_space<vmem>>, vector<3x2x8x128xf32>
      tpu.vector_store %arg6[%c0_11, %c0_12, %c0_13, %c0_14], %21 {strides = array<i32>} : memref<3x2x8x128xf32, #tpu.memory_space<vmem>>, vector<3x2x8x128xf32>,
      %cst_15 = arith.constant 0.000000e+00 : f32
      %23 = vector.broadcast %cst_15 : f32 to vector<3x2x8x128xf32>
      %c0_16 = arith.constant 0 : index
      %c0_17 = arith.constant 0 : index
      %c0_18 = arith.constant 0 : index
      %c0_19 = arith.constant 0 : index
      %24 = vector.load %arg7[%c0_16, %c0_17, %c0_18, %c0_19] : memref<3x2x8x128xf32, #tpu.memory_space<vmem>>, vector<3x2x8x128xf32>
      tpu.vector_store %arg7[%c0_16, %c0_17, %c0_18, %c0_19], %23 {strides = array<i32>} : memref<3x2x8x128xf32, #tpu.memory_space<vmem>>, vector<3x2x8x128xf32>,
      %cst_20 = arith.constant 0.000000e+00 : f32
      %25 = vector.broadcast %cst_20 : f32 to vector<3x2x8x128xf32>
      %c0_21 = arith.constant 0 : index
      %c0_22 = arith.constant 0 : index
      %c0_23 = arith.constant 0 : index
      %c0_24 = arith.constant 0 : index
      %26 = vector.load %arg8[%c0_21, %c0_22, %c0_23, %c0_24] : memref<3x2x8x128xf32, #tpu.memory_space<vmem>>, vector<3x2x8x128xf32>
      tpu.vector_store %arg8[%c0_21, %c0_22, %c0_23, %c0_24], %25 {strides = array<i32>} : memref<3x2x8x128xf32, #tpu.memory_space<vmem>>, vector<3x2x8x128xf32>,
    } else {
    }
    %c1_i32 = arith.constant 1 : i32
    %5 = arith.muli %arg0, %c1_i32 : i32
    %6 = arith.addi %5, %arg1 : i32
    %c16_i32 = arith.constant 16 : i32
    %7 = arith.muli %6, %c16_i32 : i32
    %c1_i32_2 = arith.constant 1 : i32
    %8 = arith.cmpi slt, %6, %c1_i32_2 : i32
    %c16_i32_3 = arith.constant 16 : i32
    %9 = arith.addi %7, %c16_i32_3 : i32
    %c14_i32 = arith.constant 14 : i32
    %10 = arith.cmpi sgt, %9, %c14_i32 : i32
    %c1_i32_4 = arith.constant 1 : i32
    %11 = arith.addi %arg2, %c1_i32_4 : i32
    %true = arith.constant true
    %12 = arith.xori %10, %true : i1
    %13 = arith.andi %8, %12 : i1
    %14 = arith.extui %13 : i1 to i32
    %c0_i32_5 = arith.constant 0 : i32
    %15 = arith.cmpi ne, %14, %c0_i32_5 : i32
    scf.if %15 {
      %cst = arith.constant 0.000000e+00 : f32
      %19 = vector.broadcast %cst : f32 to vector<2x8x128xf32>
      %c0_i32_7 = arith.constant 0 : i32
      %c2_i32 = arith.constant 2 : i32
      %20 = arith.addi %c0_i32_7, %c2_i32 : i32
      %c1_i32_8 = arith.constant 1 : i32
      %21:4 = scf.for %arg9 = %c0_i32_7 to %20 step %c1_i32_8 iter_args(%arg10 = %19, %arg11 = %19, %arg12 = %19, %arg13 = %19) -> (vector<2x8x128xf32>, vector<2x8x128xf32>, vector<2x8x128xf32>, vector<2x8x128xf32>)  : i32 {
        %c8_i32 = arith.constant 8 : i32
        %54 = arith.muli %arg9, %c8_i32 : i32
        %55 = tpu.assume_multiple %54, 8 : i32
        %c0_33 = arith.constant 0 : index
        %56 = arith.index_cast %55 : i32 to index
        %c0_34 = arith.constant 0 : index
        %57 = vector.load %arg4[%c0_33, %56, %c0_34] : memref<2x16x128xi32, #tpu.memory_space<vmem>>, vector<2x8x128xi32>
        %c0_35 = arith.constant 0 : index
        %c0_36 = arith.constant 0 : index
        %58 = arith.index_cast %55 : i32 to index
        %c0_37 = arith.constant 0 : index
        %59 = vector.load %arg3[%c0_35, %c0_36, %58, %c0_37] : memref<2x1x16x128xf32, #tpu.memory_space<vmem>>, vector<2x1x8x128xf32>
        %60 = vector.shape_cast %59 : vector<2x1x8x128xf32> to vector<2x8x128xf32>
        %61 = math.exp %60 : vector<2x8x128xf32>
        %62 = vector.broadcast %11 : i32 to vector<2x8x128xi32>
        %63 = arith.cmpi eq, %57, %62 : vector<2x8x128xi32>
        %c0_i32_38 = arith.constant 0 : i32
        %64 = vector.broadcast %c0_i32_38 : i32 to vector<2x8x128xi32>
        %65 = arith.cmpi ne, %57, %64 : vector<2x8x128xi32>
        %cst_39 = arith.constant 0.000000e+00 : f32
        %66 = vector.broadcast %cst_39 : f32 to vector<2x8x128xf32>
        %67 = arith.select %63, %61, %66 : vector<2x8x128xi1>, vector<2x8x128xf32>
        %cst_40 = arith.constant 0.000000e+00 : f32
        %68 = vector.broadcast %cst_40 : f32 to vector<2x8x128xf32>
        %69 = arith.select %65, %61, %68 : vector<2x8x128xi1>, vector<2x8x128xf32>
        %70 = arith.extui %63 : vector<2x8x128xi1> to vector<2x8x128xi32>
        %71 = arith.sitofp %70 : vector<2x8x128xi32> to vector<2x8x128xf32>
        %cst_41 = arith.constant 0.000000e+00 : f32
        %72 = vector.broadcast %cst_41 : f32 to vector<2x8x128xf32>
        %73 = arith.select %63, %60, %72 : vector<2x8x128xi1>, vector<2x8x128xf32>
        %74 = arith.addf %arg10, %67 : vector<2x8x128xf32>
        %75 = arith.addf %arg11, %69 : vector<2x8x128xf32>
        %76 = arith.addf %arg12, %71 : vector<2x8x128xf32>
        %77 = arith.addf %arg13, %73 : vector<2x8x128xf32>
        scf.yield %74, %75, %76, %77 : vector<2x8x128xf32>, vector<2x8x128xf32>, vector<2x8x128xf32>, vector<2x8x128xf32>
      }
      %c2_i32_9 = arith.constant 2 : i32
      %22 = arith.index_cast %arg2 : i32 to index
      %c0 = arith.constant 0 : index
      %c0_10 = arith.constant 0 : index
      %c0_11 = arith.constant 0 : index
      %23 = vector.load %arg5[%22, %c0, %c0_10, %c0_11] : memref<3x2x8x128xf32, #tpu.memory_space<vmem>>, vector<1x2x8x128xf32>
      %24 = vector.shape_cast %23 : vector<1x2x8x128xf32> to vector<2x8x128xf32>
      %25 = arith.addf %24, %21#0 : vector<2x8x128xf32>
      %26 = arith.index_cast %arg2 : i32 to index
      %c0_12 = arith.constant 0 : index
      %c0_13 = arith.constant 0 : index
      %c0_14 = arith.constant 0 : index
      %27 = vector.load %arg5[%26, %c0_12, %c0_13, %c0_14] : memref<3x2x8x128xf32, #tpu.memory_space<vmem>>, vector<1x2x8x128xf32>
      %28 = vector.shape_cast %27 : vector<1x2x8x128xf32> to vector<2x8x128xf32>
      %29 = vector.shape_cast %25 : vector<2x8x128xf32> to vector<1x2x8x128xf32>
      tpu.vector_store %arg5[%26, %c0_12, %c0_13, %c0_14], %29 {strides = array<i32>} : memref<3x2x8x128xf32, #tpu.memory_space<vmem>>, vector<1x2x8x128xf32>,
      %30 = arith.index_cast %arg2 : i32 to index
      %c0_15 = arith.constant 0 : index
      %c0_16 = arith.constant 0 : index
      %c0_17 = arith.constant 0 : index
      %31 = vector.load %arg6[%30, %c0_15, %c0_16, %c0_17] : memref<3x2x8x128xf32, #tpu.memory_space<vmem>>, vector<1x2x8x128xf32>
      %32 = vector.shape_cast %31 : vector<1x2x8x128xf32> to vector<2x8x128xf32>
      %33 = arith.addf %32, %21#1 : vector<2x8x128xf32>
      %34 = arith.index_cast %arg2 : i32 to index
      %c0_18 = arith.constant 0 : index
      %c0_19 = arith.constant 0 : index
      %c0_20 = arith.constant 0 : index
      %35 = vector.load %arg6[%34, %c0_18, %c0_19, %c0_20] : memref<3x2x8x128xf32, #tpu.memory_space<vmem>>, vector<1x2x8x128xf32>
      %36 = vector.shape_cast %35 : vector<1x2x8x128xf32> to vector<2x8x128xf32>
      %37 = vector.shape_cast %33 : vector<2x8x128xf32> to vector<1x2x8x128xf32>
      tpu.vector_store %arg6[%34, %c0_18, %c0_19, %c0_20], %37 {strides = array<i32>} : memref<3x2x8x128xf32, #tpu.memory_space<vmem>>, vector<1x2x8x128xf32>,
      %38 = arith.index_cast %arg2 : i32 to index
      %c0_21 = arith.constant 0 : index
      %c0_22 = arith.constant 0 : index
      %c0_23 = arith.constant 0 : index
      %39 = vector.load %arg7[%38, %c0_21, %c0_22, %c0_23] : memref<3x2x8x128xf32, #tpu.memory_space<vmem>>, vector<1x2x8x128xf32>
      %40 = vector.shape_cast %39 : vector<1x2x8x128xf32> to vector<2x8x128xf32>
      %41 = arith.addf %40, %21#2 : vector<2x8x128xf32>
      %42 = arith.index_cast %arg2 : i32 to index
      %c0_24 = arith.constant 0 : index
      %c0_25 = arith.constant 0 : index
      %c0_26 = arith.constant 0 : index
      %43 = vector.load %arg7[%42, %c0_24, %c0_25, %c0_26] : memref<3x2x8x128xf32, #tpu.memory_space<vmem>>, vector<1x2x8x128xf32>
      %44 = vector.shape_cast %43 : vector<1x2x8x128xf32> to vector<2x8x128xf32>
      %45 = vector.shape_cast %41 : vector<2x8x128xf32> to vector<1x2x8x128xf32>
      tpu.vector_store %arg7[%42, %c0_24, %c0_25, %c0_26], %45 {strides = array<i32>} : memref<3x2x8x128xf32, #tpu.memory_space<vmem>>, vector<1x2x8x128xf32>,
      %46 = arith.index_cast %arg2 : i32 to index
      %c0_27 = arith.constant 0 : index
      %c0_28 = arith.constant 0 : index
      %c0_29 = arith.constant 0 : index
      %47 = vector.load %arg8[%46, %c0_27, %c0_28, %c0_29] : memref<3x2x8x128xf32, #tpu.memory_space<vmem>>, vector<1x2x8x128xf32>
      %48 = vector.shape_cast %47 : vector<1x2x8x128xf32> to vector<2x8x128xf32>
      %49 = arith.addf %48, %21#3 : vector<2x8x128xf32>
      %50 = arith.index_cast %arg2 : i32 to index
      %c0_30 = arith.constant 0 : index
      %c0_31 = arith.constant 0 : index
      %c0_32 = arith.constant 0 : index
      %51 = vector.load %arg8[%50, %c0_30, %c0_31, %c0_32] : memref<3x2x8x128xf32, #tpu.memory_space<vmem>>, vector<1x2x8x128xf32>
      %52 = vector.shape_cast %51 : vector<1x2x8x128xf32> to vector<2x8x128xf32>
      %53 = vector.shape_cast %49 : vector<2x8x128xf32> to vector<1x2x8x128xf32>
      tpu.vector_store %arg8[%50, %c0_30, %c0_31, %c0_32], %53 {strides = array<i32>} : memref<3x2x8x128xf32, #tpu.memory_space<vmem>>, vector<1x2x8x128xf32>,
    } else {
    }
    %16 = arith.andi %8, %10 : i1
    %17 = arith.extui %16 : i1 to i32
    %c0_i32_6 = arith.constant 0 : i32
    %18 = arith.cmpi ne, %17, %c0_i32_6 : i32
    scf.if %18 {
      %cst = arith.constant 0.000000e+00 : f32
      %19 = vector.broadcast %cst : f32 to vector<2x8x128xf32>
      %20 = tpu.iota {dimensions = array<i32: 1>} : vector<1x8x128xi32>
      %c0_i32_7 = arith.constant 0 : i32
      %c2_i32 = arith.constant 2 : i32
      %21 = arith.addi %c0_i32_7, %c2_i32 : i32
      %c1_i32_8 = arith.constant 1 : i32
      %22:4 = scf.for %arg9 = %c0_i32_7 to %21 step %c1_i32_8 iter_args(%arg10 = %19, %arg11 = %19, %arg12 = %19, %arg13 = %19) -> (vector<2x8x128xf32>, vector<2x8x128xf32>, vector<2x8x128xf32>, vector<2x8x128xf32>)  : i32 {
        %c8_i32 = arith.constant 8 : i32
        %55 = arith.muli %arg9, %c8_i32 : i32
        %56 = tpu.assume_multiple %55, 8 : i32
        %57 = arith.addi %7, %56 : i32
        %58 = vector.broadcast %57 : i32 to vector<1x8x128xi32>
        %59 = arith.addi %58, %20 : vector<1x8x128xi32>
        %c14_i32_33 = arith.constant 14 : i32
        %60 = vector.broadcast %c14_i32_33 : i32 to vector<1x8x128xi32>
        %61 = arith.cmpi slt, %59, %60 : vector<1x8x128xi32>
        %c0_34 = arith.constant 0 : index
        %62 = arith.index_cast %56 : i32 to index
        %c0_35 = arith.constant 0 : index
        %63 = vector.load %arg4[%c0_34, %62, %c0_35] : memref<2x16x128xi32, #tpu.memory_space<vmem>>, vector<2x8x128xi32>
        %c0_36 = arith.constant 0 : index
        %c0_37 = arith.constant 0 : index
        %64 = arith.index_cast %56 : i32 to index
        %c0_38 = arith.constant 0 : index
        %65 = vector.load %arg3[%c0_36, %c0_37, %64, %c0_38] : memref<2x1x16x128xf32, #tpu.memory_space<vmem>>, vector<2x1x8x128xf32>
        %66 = vector.shape_cast %65 : vector<2x1x8x128xf32> to vector<2x8x128xf32>
        %c0_i32_39 = arith.constant 0 : i32
        %67 = vector.shape_cast %61 : vector<1x8x128xi1> to vector<1x8x128xi1>
        %68 = vector.broadcast %67 : vector<1x8x128xi1> to vector<2x8x128xi1>
        %69 = vector.broadcast %c0_i32_39 : i32 to vector<2x8x128xi32>
        %70 = arith.select %68, %63, %69 : vector<2x8x128xi1>, vector<2x8x128xi32>
        %cst_40 = arith.constant 0.000000e+00 : f32
        %71 = vector.shape_cast %61 : vector<1x8x128xi1> to vector<1x8x128xi1>
        %72 = vector.broadcast %71 : vector<1x8x128xi1> to vector<2x8x128xi1>
        %73 = vector.broadcast %cst_40 : f32 to vector<2x8x128xf32>
        %74 = arith.select %72, %66, %73 : vector<2x8x128xi1>, vector<2x8x128xf32>
        %75 = math.exp %74 : vector<2x8x128xf32>
        %76 = vector.broadcast %11 : i32 to vector<2x8x128xi32>
        %77 = arith.cmpi eq, %70, %76 : vector<2x8x128xi32>
        %c0_i32_41 = arith.constant 0 : i32
        %78 = vector.broadcast %c0_i32_41 : i32 to vector<2x8x128xi32>
        %79 = arith.cmpi ne, %70, %78 : vector<2x8x128xi32>
        %cst_42 = arith.constant 0.000000e+00 : f32
        %80 = vector.broadcast %cst_42 : f32 to vector<2x8x128xf32>
        %81 = arith.select %77, %75, %80 : vector<2x8x128xi1>, vector<2x8x128xf32>
        %cst_43 = arith.constant 0.000000e+00 : f32
        %82 = vector.broadcast %cst_43 : f32 to vector<2x8x128xf32>
        %83 = arith.select %79, %75, %82 : vector<2x8x128xi1>, vector<2x8x128xf32>
        %84 = arith.extui %77 : vector<2x8x128xi1> to vector<2x8x128xi32>
        %85 = arith.sitofp %84 : vector<2x8x128xi32> to vector<2x8x128xf32>
        %cst_44 = arith.constant 0.000000e+00 : f32
        %86 = vector.broadcast %cst_44 : f32 to vector<2x8x128xf32>
        %87 = arith.select %77, %74, %86 : vector<2x8x128xi1>, vector<2x8x128xf32>
        %88 = arith.addf %arg10, %81 : vector<2x8x128xf32>
        %89 = arith.addf %arg11, %83 : vector<2x8x128xf32>
        %90 = arith.addf %arg12, %85 : vector<2x8x128xf32>
        %91 = arith.addf %arg13, %87 : vector<2x8x128xf32>
        scf.yield %88, %89, %90, %91 : vector<2x8x128xf32>, vector<2x8x128xf32>, vector<2x8x128xf32>, vector<2x8x128xf32>
      }
      %c2_i32_9 = arith.constant 2 : i32
      %23 = arith.index_cast %arg2 : i32 to index
      %c0 = arith.constant 0 : index
      %c0_10 = arith.constant 0 : index
      %c0_11 = arith.constant 0 : index
      %24 = vector.load %arg5[%23, %c0, %c0_10, %c0_11] : memref<3x2x8x128xf32, #tpu.memory_space<vmem>>, vector<1x2x8x128xf32>
      %25 = vector.shape_cast %24 : vector<1x2x8x128xf32> to vector<2x8x128xf32>
      %26 = arith.addf %25, %22#0 : vector<2x8x128xf32>
      %27 = arith.index_cast %arg2 : i32 to index
      %c0_12 = arith.constant 0 : index
      %c0_13 = arith.constant 0 : index
      %c0_14 = arith.constant 0 : index
      %28 = vector.load %arg5[%27, %c0_12, %c0_13, %c0_14] : memref<3x2x8x128xf32, #tpu.memory_space<vmem>>, vector<1x2x8x128xf32>
      %29 = vector.shape_cast %28 : vector<1x2x8x128xf32> to vector<2x8x128xf32>
      %30 = vector.shape_cast %26 : vector<2x8x128xf32> to vector<1x2x8x128xf32>
      tpu.vector_store %arg5[%27, %c0_12, %c0_13, %c0_14], %30 {strides = array<i32>} : memref<3x2x8x128xf32, #tpu.memory_space<vmem>>, vector<1x2x8x128xf32>,
      %31 = arith.index_cast %arg2 : i32 to index
      %c0_15 = arith.constant 0 : index
      %c0_16 = arith.constant 0 : index
      %c0_17 = arith.constant 0 : index
      %32 = vector.load %arg6[%31, %c0_15, %c0_16, %c0_17] : memref<3x2x8x128xf32, #tpu.memory_space<vmem>>, vector<1x2x8x128xf32>
      %33 = vector.shape_cast %32 : vector<1x2x8x128xf32> to vector<2x8x128xf32>
      %34 = arith.addf %33, %22#1 : vector<2x8x128xf32>
      %35 = arith.index_cast %arg2 : i32 to index
      %c0_18 = arith.constant 0 : index
      %c0_19 = arith.constant 0 : index
      %c0_20 = arith.constant 0 : index
      %36 = vector.load %arg6[%35, %c0_18, %c0_19, %c0_20] : memref<3x2x8x128xf32, #tpu.memory_space<vmem>>, vector<1x2x8x128xf32>
      %37 = vector.shape_cast %36 : vector<1x2x8x128xf32> to vector<2x8x128xf32>
      %38 = vector.shape_cast %34 : vector<2x8x128xf32> to vector<1x2x8x128xf32>
      tpu.vector_store %arg6[%35, %c0_18, %c0_19, %c0_20], %38 {strides = array<i32>} : memref<3x2x8x128xf32, #tpu.memory_space<vmem>>, vector<1x2x8x128xf32>,
      %39 = arith.index_cast %arg2 : i32 to index
      %c0_21 = arith.constant 0 : index
      %c0_22 = arith.constant 0 : index
      %c0_23 = arith.constant 0 : index
      %40 = vector.load %arg7[%39, %c0_21, %c0_22, %c0_23] : memref<3x2x8x128xf32, #tpu.memory_space<vmem>>, vector<1x2x8x128xf32>
      %41 = vector.shape_cast %40 : vector<1x2x8x128xf32> to vector<2x8x128xf32>
      %42 = arith.addf %41, %22#2 : vector<2x8x128xf32>
      %43 = arith.index_cast %arg2 : i32 to index
      %c0_24 = arith.constant 0 : index
      %c0_25 = arith.constant 0 : index
      %c0_26 = arith.constant 0 : index
      %44 = vector.load %arg7[%43, %c0_24, %c0_25, %c0_26] : memref<3x2x8x128xf32, #tpu.memory_space<vmem>>, vector<1x2x8x128xf32>
      %45 = vector.shape_cast %44 : vector<1x2x8x128xf32> to vector<2x8x128xf32>
      %46 = vector.shape_cast %42 : vector<2x8x128xf32> to vector<1x2x8x128xf32>
      tpu.vector_store %arg7[%43, %c0_24, %c0_25, %c0_26], %46 {strides = array<i32>} : memref<3x2x8x128xf32, #tpu.memory_space<vmem>>, vector<1x2x8x128xf32>,
      %47 = arith.index_cast %arg2 : i32 to index
      %c0_27 = arith.constant 0 : index
      %c0_28 = arith.constant 0 : index
      %c0_29 = arith.constant 0 : index
      %48 = vector.load %arg8[%47, %c0_27, %c0_28, %c0_29] : memref<3x2x8x128xf32, #tpu.memory_space<vmem>>, vector<1x2x8x128xf32>
      %49 = vector.shape_cast %48 : vector<1x2x8x128xf32> to vector<2x8x128xf32>
      %50 = arith.addf %49, %22#3 : vector<2x8x128xf32>
      %51 = arith.index_cast %arg2 : i32 to index
      %c0_30 = arith.constant 0 : index
      %c0_31 = arith.constant 0 : index
      %c0_32 = arith.constant 0 : index
      %52 = vector.load %arg8[%51, %c0_30, %c0_31, %c0_32] : memref<3x2x8x128xf32, #tpu.memory_space<vmem>>, vector<1x2x8x128xf32>
      %53 = vector.shape_cast %52 : vector<1x2x8x128xf32> to vector<2x8x128xf32>
      %54 = vector.shape_cast %50 : vector<2x8x128xf32> to vector<1x2x8x128xf32>
      tpu.vector_store %arg8[%51, %c0_30, %c0_31, %c0_32], %54 {strides = array<i32>} : memref<3x2x8x128xf32, #tpu.memory_space<vmem>>, vector<1x2x8x128xf32>,
    } else {
    }
    return
  }
  func.func @transform_0(%arg0: i32, %arg1: i32, %arg2: i32) -> (i32, i32, i32, i32) {
    %c1_i32 = arith.constant 1 : i32
    %0 = arith.addi %arg2, %c1_i32 : i32
    %c1_i32_0 = arith.constant 1 : i32
    %1 = arith.muli %arg0, %c1_i32_0 : i32
    %2 = arith.addi %1, %arg1 : i32
    %c0_i32 = arith.constant 0 : i32
    %3 = arith.minsi %2, %c0_i32 : i32
    %c0_i32_1 = arith.constant 0 : i32
    %c0_i32_2 = arith.constant 0 : i32
    %c0_i32_3 = arith.constant 0 : i32
    return %c0_i32_1, %0, %3, %c0_i32_2 : i32, i32, i32, i32
  }
  func.func @transform_1(%arg0: i32, %arg1: i32, %arg2: i32) -> (i32, i32, i32) {
    %c1_i32 = arith.constant 1 : i32
    %0 = arith.muli %arg0, %c1_i32 : i32
    %1 = arith.addi %0, %arg1 : i32
    %c0_i32 = arith.constant 0 : i32
    %2 = arith.minsi %1, %c0_i32 : i32
    %c0_i32_0 = arith.constant 0 : i32
    %c0_i32_1 = arith.constant 0 : i32
    %c0_i32_2 = arith.constant 0 : i32
    return %c0_i32_0, %2, %c0_i32_1 : i32, i32, i32
  }
  func.func @transform_2(%arg0: i32, %arg1: i32, %arg2: i32) -> (i32, i32, i32, i32) {
    %c0_i32 = arith.constant 0 : i32
    %c0_i32_0 = arith.constant 0 : i32
    %c0_i32_1 = arith.constant 0 : i32
    %c0_i32_2 = arith.constant 0 : i32
    return %arg0, %c0_i32, %c0_i32_0, %c0_i32_1 : i32, i32, i32, i32
  }
  func.func @transform_3(%arg0: i32, %arg1: i32, %arg2: i32) -> (i32, i32, i32, i32) {
    %c0_i32 = arith.constant 0 : i32
    %c0_i32_0 = arith.constant 0 : i32
    %c0_i32_1 = arith.constant 0 : i32
    %c0_i32_2 = arith.constant 0 : i32
    return %arg0, %c0_i32, %c0_i32_0, %c0_i32_1 : i32, i32, i32, i32
  }
  func.func @transform_4(%arg0: i32, %arg1: i32, %arg2: i32) -> (i32, i32, i32, i32) {
    %c0_i32 = arith.constant 0 : i32
    %c0_i32_0 = arith.constant 0 : i32
    %c0_i32_1 = arith.constant 0 : i32
    %c0_i32_2 = arith.constant 0 : i32
    return %arg0, %c0_i32, %c0_i32_0, %c0_i32_1 : i32, i32, i32, i32
  }
  func.func @transform_5(%arg0: i32, %arg1: i32, %arg2: i32) -> (i32, i32, i32, i32) {
    %c0_i32 = arith.constant 0 : i32
    %c0_i32_0 = arith.constant 0 : i32
    %c0_i32_1 = arith.constant 0 : i32
    %c0_i32_2 = arith.constant 0 : i32
    return %arg0, %c0_i32, %c0_i32_0, %c0_i32_1 : i32, i32, i32, i32
  }
}

</mosaic_0001>

<bundles_post_ra>
// kernel: dice_ce_loss.1
= control target key start
LH: loop header
LB: loop body
LE: loop exit
PB: predicated region body
PF: predicated region fallthrough
CT: control target
= control target key end

     0   :  { %s1184_s18 = smov 0   ;;  %s1186_s19 = smov 0   ;;  %s1399_s0 = inlined_call_operand.vmem [shape: f32[2,4,14,128], index: 0, kind: input, shape index: {}]   ;;  %s1400_s1 = inlined_call_operand.vmem [shape: s32[2,14,128], index: 1, kind: input, shape index: {}]   ;;  %s1401_s2 = inlined_call_operand.vmem [shape: f32[3,2,8,128], index: 2, kind: output, shape index: {0}]   ;;  %s1402_s3 = inlined_call_operand.vmem [shape: f32[3,2,8,128], index: 3, kind: output, shape index: {1}]   ;;  %s1403_s4 = inlined_call_operand.vmem [shape: f32[3,2,8,128], index: 4, kind: output, shape index: {2}]   ;;  %s1404_s5 = inlined_call_operand.vmem [shape: f32[3,2,8,128], index: 5, kind: output, shape index: {3}]  }
   0x1   :  { %s1188_s20 = smov 0   ;;  %s1190_s21 = smov 0  }
   0x2   :  { %s1192_s22 = smov 0  }
   0x3 LB: > { %s28_s23 = sadd.s32 1, %s1110_s21  ;;  %p59_p1 = scmp.ne.s32.totalorder %s1102_s19, %s1098_s18  ;;  %s1114_s22 = sphi %s1192_s22, %s16_s22   ;;  %s1110_s21 = sphi %s1190_s21, %s1416_s21   ;;  %s1106_s20 = sphi %s1188_s20, %s1415_s20   ;;  %s1102_s19 = sphi %s1186_s19, %s1414_s19   ;;  %s1098_s18 = sphi %s1184_s18, %s1413_s18  }
   0x4   : > { %p29_p0 = scmp.ge.s32.totalorder %s28_s23, 3  ;;  %p60_p2 = scmp.eq.s32.totalorder %s1114_s22, 0 }
   0x5   : > { %s52_s27 = sadd.s32 1, %s1102_s19  ;;  %p891_p5 = scmp.ge.s32.totalorder %s1114_s22, 3 }
   0x6   : > { %s1213_s24 = scalar_select %p29_p0, 0, %s28_s23  }
   0x7   : > { %p61_p3 = por %p60_p2, %p59_p1  ;;  %236 = sbr.rel (%p891_p5) target bundleno = 21 (0x15), region = 20 }
   0x8   : > { %s43_s25 = sadd.s32 1, %s1213_s24 }
   0x9   : > { %s47_s26 = ssub.s32 %s28_s23, %s43_s25 }
   0xa   : > { %p50_p4 = scmp.eq.s32.totalorder %s47_s26, 0 }
   0xc   : > { %s1218_s28 = scalar_select %p50_p4, %s1102_s19, %s52_s27  }
   0xe   : > { %239 = sbr.rel (!%p61_p3) target bundleno = 21 (0x15), region = 24  ;;  %s241_s29 = sand.u32 (%p61_p3), 1, %s1102_s19  }
   0xf   : > { %s920_s30 = sshll.u32 (%p61_p3), %s1110_s21, 4  ;;  %s892_s6 = sshll.u32 (%p61_p3), %s241_s29, 5 }
  0x10   : > { %s704_s9 = scalar_lea.vmem (%p61_p3), %s1399_s0, %s920_s30  ;;  %s243_s10 = scalar_lea.vmem (%p61_p3), [#allocation2], %s892_s6 }
  0x11   : > { %v895_v0 = vld [vmem:[%s704_s9 + $0x10] sm:$0xff] (%p61_p3)  ;;  %v896_v1 = vld [vmem:[%s704_s9 + $0x18] sm:$0xff] (%p61_p3) }
  0x12   : > { %v897_v2 = vld [vmem:[%s704_s9 + $0x50] sm:$0xff] (%p61_p3)  ;;  %287 = vst [vmem:[%s243_s10] sm:$0xff] (%p61_p3), %v895_v0  ;;  %289 = vst [vmem:[%s243_s10 + $0x8] sm:$0xff] (%p61_p3), %v896_v1  ;;  %v898_v3 = vld [vmem:[%s704_s9 + $0x58] sm:$0xff] (%p61_p3) }
  0x13   : > { %291 = vst [vmem:[%s243_s10 + $0x10] sm:$0xff] (%p61_p3), %v897_v2  ;;  %293 = vst [vmem:[%s243_s10 + $0x18] sm:$0xff] (%p61_p3), %v898_v3 }
  0x15 PF: > { %p899_p6 = scmp.ge.s32.totalorder %s1114_s22, 1  ;;  %p298_p7 = scmp.lt.s32.totalorder %s1114_s22, 4 }
  0x17   : > { %p299_p8 = pnand %p899_p6, %p298_p7 }
  0x18   : > { %s305_s11 = sand.u32 (!%p299_p8), 1, %s1098_s18   ;;  %p405_p9 = scmp.eq.s32.totalorder (!%p299_p8), %s1106_s20, 0 }
  0x19   : > { %302 = sbr.rel (%p299_p8) target bundleno = 74 (0x4a), region = 62  ;;  %s1230_s12 = sshll.u32 (!%p299_p8), %s305_s11, 5 }
  0x1a   : > { %s307_s13 = scalar_lea.vmem (!%p299_p8), [#allocation2], %s1230_s12 }
  0x20   : > { %409 = sbr.rel (!%p405_p9) target bundleno = 45 (0x2d), region = 70  ;;  %v1152_v4 = vmov (%p405_p9), 0.0  }
  0x21   : > { %410 = vst [vmem:[%s1401_s2] sm:$0xff] (%p405_p9), %v1152_v4  ;;  %411 = vst [vmem:[%s1401_s2 + $0x8] sm:$0xff] (%p405_p9), %v1152_v4 }
  0x22   : > { %412 = vst [vmem:[%s1401_s2 + $0x10] sm:$0xff] (%p405_p9), %v1152_v4  ;;  %413 = vst [vmem:[%s1401_s2 + $0x18] sm:$0xff] (%p405_p9), %v1152_v4 }
  0x23   : > { %414 = vst [vmem:[%s1401_s2 + $0x20] sm:$0xff] (%p405_p9), %v1152_v4  ;;  %415 = vst [vmem:[%s1401_s2 + $0x28] sm:$0xff] (%p405_p9), %v1152_v4 }
  0x24   : > { %416 = vst [vmem:[%s1402_s3] sm:$0xff] (%p405_p9), %v1152_v4  ;;  %417 = vst [vmem:[%s1402_s3 + $0x8] sm:$0xff] (%p405_p9), %v1152_v4 }
  0x25   : > { %418 = vst [vmem:[%s1402_s3 + $0x10] sm:$0xff] (%p405_p9), %v1152_v4  ;;  %419 = vst [vmem:[%s1402_s3 + $0x18] sm:$0xff] (%p405_p9), %v1152_v4 }
  0x26   : > { %420 = vst [vmem:[%s1402_s3 + $0x20] sm:$0xff] (%p405_p9), %v1152_v4  ;;  %421 = vst [vmem:[%s1402_s3 + $0x28] sm:$0xff] (%p405_p9), %v1152_v4 }
  0x27   : > { %422 = vst [vmem:[%s1403_s4] sm:$0xff] %v1152_v4  ;;  %423 = vst [vmem:[%s1403_s4 + $0x8] sm:$0xff] %v1152_v4 }
  0x28   : > { %424 = vst [vmem:[%s1403_s4 + $0x10] sm:$0xff] %v1152_v4  ;;  %425 = vst [vmem:[%s1403_s4 + $0x18] sm:$0xff] %v1152_v4 }
  0x29   : > { %426 = vst [vmem:[%s1403_s4 + $0x20] sm:$0xff] %v1152_v4  ;;  %427 = vst [vmem:[%s1403_s4 + $0x28] sm:$0xff] %v1152_v4 }
  0x2a   : > { %428 = vst [vmem:[%s1404_s5] sm:$0xff] %v1152_v4  ;;  %429 = vst [vmem:[%s1404_s5 + $0x8] sm:$0xff] %v1152_v4 }
  0x2b   : > { %430 = vst [vmem:[%s1404_s5 + $0x10] sm:$0xff] %v1152_v4  ;;  %431 = vst [vmem:[%s1404_s5 + $0x18] sm:$0xff] %v1152_v4 }
  0x2c   : > { %432 = vst [vmem:[%s1404_s5 + $0x20] sm:$0xff] %v1152_v4  ;;  %433 = vst [vmem:[%s1404_s5 + $0x28] sm:$0xff] %v1152_v4 }
  0x2d PF: > { %s439_s9 = sadd.s32 1, %s1106_s20  ;;  %v526_v5 = vlaneseq  ;;  %v1308_v7 = vmov 0.0   ;;  %v1310_v8 = vmov 0.0   ;;  %v1312_v9 = vmov 0.0   ;;  %s1324_s10 = smov 0  }
  0x2e   : > { %v1314_v10 = vmov 0.0   ;;  %v1316_v11 = vmov 0.0   ;;  %v1318_v12 = vmov 0.0   ;;  %v1320_v13 = vmov 0.0  }
  0x2f   : > { %v1306_v6 = vshrl.u32 %v526_v5, 7  ;;  %v1322_v14 = vmov 0.0  }
  0x30 LB: >> { %s906_s11 = sshll.u32 %s1150_s10, 3  ;;  %v563_v21 = vstv %s439_s9  ;;  %v1153_v28 = vmov 0.0   ;;  %s533_s10 = sadd.s32 1, %s1150_s10   ;;  %s1150_s10 = sphi %s1324_s10, %s533_s10   ;;  %v1146_v14 = vphi %v1322_v14, %v1412_v14   ;;  %v1142_v13 = vphi %v1320_v13, %v1411_v13   ;;  %v1138_v12 = vphi %v1318_v12, %v1410_v12   ;;  %v1134_v11 = vphi %v1316_v11, %v1409_v11   ;;  %v1130_v10 = vphi %v1314_v10, %v1408_v10   ;;  %v1126_v9 = vphi %v1312_v9, %v1407_v9   ;;  %v1122_v8 = vphi %v1310_v8, %v1406_v8   ;;  %v1118_v7 = vphi %v1308_v7, %v1405_v7  }
  0x31   : >> { %s547_s16 = scalar_lea.vmem %s1400_s1, %s906_s11  ;;  %s550_s17 = scalar_lea.vmem %s307_s13, %s906_s11 [#allocation2]  ;;  %v544_v15 = vstv %s906_s11 }
  0x32   : >> { %v548_v16 = vld [vmem:[%s547_s16] sm:$0xff]  ;;  %v545_v17 = vadd.s32 %v544_v15, %v1306_v6  ;;  %v549_v18 = vld [vmem:[%s547_s16 + $0x10] sm:$0xff]  ;;  %p530_p10 = scmp.ge.s32.totalorder %s533_s10, 2  }
  0x33   : >> { %v551_v19 = vld [vmem:[%s550_s17] sm:$0xff]  ;;  %v552_v20 = vld [vmem:[%s550_s17 + $0x10] sm:$0xff]  ;;  %s909_s23 = sshll.u32 (%p530_p10), %s1106_s20, 4 }
  0x34   : >> { %vm546_vm0 = vcmp.lt.s32.totalorder %v545_v17, 14  ;;  %s587_s26 = scalar_lea.vmem (%p530_p10), %s1401_s2, %s909_s23  ;;  %s594_s30 = scalar_lea.vmem (%p530_p10), %s1402_s3, %s909_s23 }
  0x35   : >> { %v555_v22 = vsel %vm546_vm0, %v548_v16, 0  ;;  %v556_v23 = vsel %vm546_vm0, %v549_v18, 0  ;;  %v557_v24 = vsel %vm546_vm0, %v551_v19, 0.0  ;;  %v558_v25 = vsel %vm546_vm0, %v552_v20, 0.0  ;;  %v588_v47 = vld [vmem:[%s587_s26] sm:$0xff] (%p530_p10)  ;;  %v589_v48 = vld [vmem:[%s587_s26 + $0x8] sm:$0xff] (%p530_p10)  ;;  %s601_s8 = scalar_lea.vmem (%p530_p10), %s1403_s4, %s909_s23  ;;  %s608_s12 = scalar_lea.vmem (%p530_p10), %s1404_s5, %s909_s23 }
  0x36   : >> { %v559_v26 = vmul.f32 1.442695, %v557_v24  ;;  %v561_v27 = vmul.f32 1.442695, %v558_v25  ;;  %vm564_vm1 = vcmp.eq.s32.totalorder %v555_v22, %v563_v21  ;;  %vm565_vm2 = vcmp.eq.s32.totalorder %v556_v23, %v563_v21  ;;  %v595_v49 = vld [vmem:[%s594_s30] sm:$0xff] (%p530_p10)  ;;  %v596_v53 = vld [vmem:[%s594_s30 + $0x8] sm:$0xff] (%p530_p10) }
  0x37   : >> { %v907_v29 = vsel %vm564_vm1, 1.0, %v1153_v28  ;;  %v908_v30 = vsel %vm565_vm2, 1.0, %v1153_v28  ;;  %v576_v31 = vsel %vm564_vm1, %v557_v24, 0.0  ;;  %v577_v32 = vsel %vm565_vm2, %v558_v25, 0.0  ;;  %v602_v54 = vld [vmem:[%s601_s8] sm:$0xff] (%p530_p10)  ;;  %v603_v55 = vld [vmem:[%s601_s8 + $0x8] sm:$0xff] (%p530_p10) }
  0x38   : >> { %1036 = vpow2.f32 %v559_v26  ;;  %v582_v33 = vadd.f32 %v1130_v10, %v907_v29   ;;  %v583_v34 = vadd.f32 %v1126_v9, %v908_v30   ;;  %v584_v35 = vadd.f32 %v1122_v8, %v576_v31   ;;  %v609_v59 = vld [vmem:[%s608_s12] sm:$0xff] (%p530_p10)  ;;  %v610_v60 = vld [vmem:[%s608_s12 + $0x8] sm:$0xff] (%p530_p10) }
  0x39   : >> { %1038 = vpow2.f32 %v561_v27  ;;  %v585_v36 = vadd.f32 %v1118_v7, %v577_v32   ;;  %vm566_vm3 = vcmp.ne.s32.totalorder %v555_v22, 0  ;;  %vm567_vm4 = vcmp.ne.s32.totalorder %v556_v23, 0 }
  0x3a   : >> { %v1406_v8 = vmov %v584_v35  ;;  %v1407_v9 = vmov %v583_v34  ;;  %v1408_v10 = vmov %v582_v33  ;;  %v604_v57 = vadd.f32 (%p530_p10), %v602_v54, %v582_v33 }
  0x3b   : >> { %v1405_v7 = vmov %v585_v36  ;;  %v605_v58 = vadd.f32 (%p530_p10), %v603_v55, %v583_v34  ;;  %v611_v61 = vadd.f32 (%p530_p10), %v609_v59, %v584_v35  ;;  %v612_v62 = vadd.f32 (%p530_p10), %v610_v60, %v585_v36 }
  0x3c   : > { %606 = vst [vmem:[%s601_s8] sm:$0xff] (%p530_p10), %v604_v57 }
  0x3d   : > { %607 = vst [vmem:[%s601_s8 + $0x8] sm:$0xff] (%p530_p10), %v605_v58  ;;  %613 = vst [vmem:[%s608_s12] sm:$0xff] (%p530_p10), %v611_v61 }
  0x3e   : > { %614 = vst [vmem:[%s608_s12 + $0x8] sm:$0xff] (%p530_p10), %v612_v62 }
  0x41   : > { %532 = sbr.rel (!%p530_p10) target bundleno = 48 (0x30), region = 189 }
  0x42   : >> { %v1037_v37 = vpop.eup %1036 }
  0x43   : >> { %v1039_v38 = vpop.eup %1038  ;;  %v568_v39 = vsel %vm564_vm1, %v1037_v37, 0.0  ;;  %v570_v40 = vsel %vm566_vm3, %v1037_v37, 0.0 }
  0x44   : >> { %v569_v41 = vsel %vm565_vm2, %v1039_v38, 0.0  ;;  %v571_v42 = vsel %vm567_vm4, %v1039_v38, 0.0  ;;  %v578_v43 = vadd.f32 %v1146_v14, %v568_v39   ;;  %v580_v44 = vadd.f32 %v1138_v12, %v570_v40  }
  0x45   : >> { %v579_v45 = vadd.f32 %v1142_v13, %v569_v41   ;;  %v581_v46 = vadd.f32 %v1134_v11, %v571_v42  }
  0x46   : >> { %v1410_v12 = vmov %v580_v44  ;;  %v1412_v14 = vmov %v578_v43  ;;  %v590_v50 = vadd.f32 (%p530_p10), %v588_v47, %v578_v43  ;;  %v597_v52 = vadd.f32 (%p530_p10), %v595_v49, %v580_v44 }
  0x47   : >> { %v1409_v11 = vmov %v581_v46  ;;  %v1411_v13 = vmov %v579_v45  ;;  %v591_v51 = vadd.f32 (%p530_p10), %v589_v48, %v579_v45  ;;  %v598_v56 = vadd.f32 (%p530_p10), %v596_v53, %v581_v46 }
  0x48   : > { %592 = vst [vmem:[%s587_s26] sm:$0xff] %v590_v50  ;;  %599 = vst [vmem:[%s594_s30] sm:$0xff] %v597_v52 }
  0x49   : > { %593 = vst [vmem:[%s587_s26 + $0x8] sm:$0xff] %v591_v51  ;;  %600 = vst [vmem:[%s594_s30 + $0x8] sm:$0xff] %v598_v56 }
  0x4a PF: > { %s16_s22 = sadd.s32 1, %s1114_s22   ;;  %s1413_s18 = smov %s1102_s19 }
  0x4b   : > { %p13_p11 = scmp.ge.s32.totalorder %s16_s22, 5   ;;  %s1414_s19 = smov %s1218_s28 }
  0x4c   : > { %s1415_s20 = smov %s1110_s21  ;;  %s1416_s21 = smov %s1213_s24 }
  0x4d   :  { %15 = sbr.rel (!%p13_p11) target bundleno = 3 (0x3), region = 200 }

</bundles_post_ra>
